<compile_context>
chip_gen: v5e
topology: v5e:2x2
jax: 0.10.0
libtpu: 0.0.40
codegen_flags: <defaults>
</compile_context>

<pallas_src>
import functools
import math

import jax
import jax.numpy as jnp
import numpy as np
from jax.experimental import pallas as pl
from jax.experimental.pallas import tpu as pltpu


def _round_up(x, m):
    return ((x + m - 1) // m) * m


# ---------------------------------------------------------------------------
# Kernels
# ---------------------------------------------------------------------------
def _sinekan_harmonic_kernel(x_ref, w_ref, b_ref, o_ref, *, grid_size, base_freq):
    """Fast path: freq[g] == (g+1) * base_freq (the module's init pattern).

    x_ref: (TM, K) VMEM      w_ref: (2*G*K, Np) VMEM (phase folded in)
    b_ref: (1, Np) VMEM      o_ref: (TM, Np) VMEM
    """
    x = x_ref[...].astype(jnp.float32)
    theta = x * jnp.float32(base_freq)                       # (TM, K)
    s1 = jnp.sin(theta)
    c1 = jnp.cos(theta)
    sins = [s1]
    coss = [c1]
    # sin/cos((g+1)*theta) via angle addition: VPU work instead of G*K EUP sins.
    for _ in range(grid_size - 1):
        s_p, c_p = sins[-1], coss[-1]
        sins.append(s_p * c1 + c_p * s1)
        coss.append(c_p * c1 - s_p * s1)
    feat = jnp.concatenate(sins + coss, axis=1)              # (TM, 2*G*K)
    acc = jnp.dot(feat.astype(w_ref.dtype), w_ref[...],
                  preferred_element_type=jnp.float32)        # (TM, Np), f32 acc
    o_ref[...] = (acc + b_ref[...]).astype(o_ref.dtype)


def _sinekan_generic_kernel(x_ref, freq_ref, phase_ref, w_ref, b_ref, o_ref, *,
                            grid_size):
    """General frequencies (no harmonic structure assumed).

    x_ref: (TM, K)   freq_ref/phase_ref: (1, G*K)   w_ref: (G*K, Np)   b_ref: (1, Np)
    """
    x = x_ref[...].astype(jnp.float32)
    xg = jnp.concatenate([x] * grid_size, axis=1)            # (TM, G*K)
    feat = jnp.sin(xg * freq_ref[...] + phase_ref[...])      # (TM, G*K)
    acc = jnp.dot(feat.astype(w_ref.dtype), w_ref[...],
                  preferred_element_type=jnp.float32)
    o_ref[...] = (acc + b_ref[...]).astype(o_ref.dtype)


# ---------------------------------------------------------------------------
# Host-side parameter packing (one-time, concrete arrays)
# ---------------------------------------------------------------------------
def prepare_kernel_params(freq, phase, amplitudes, bias, *, use_bf16=True,
                          force_generic=False):
    """Pack PyTorch-layout parameters into kernel-friendly layouts.

    freq: (G,) or (1,1,1,G); phase: (1,1,K,G); amplitudes: (N,K,G); bias: (1,N)
    """
    freq = np.asarray(jax.device_get(freq), np.float32).reshape(-1)
    G = freq.shape[0]
    amplitudes = np.asarray(jax.device_get(amplitudes), np.float32)
    N, K, _ = amplitudes.shape
    phase_kg = np.asarray(jax.device_get(phase), np.float32).reshape(K, G)
    bias = np.asarray(jax.device_get(bias), np.float32).reshape(1, N)

    Np = _round_up(N, 128)                          # lane-dense output stores
    amp_gkn = np.transpose(amplitudes, (2, 1, 0))   # (G, K, N)
    phase_gk = phase_kg.T                           # (G, K)
    w_dtype = jnp.bfloat16 if use_bf16 else jnp.float32

    harmonic = (not force_generic) and bool(
        np.allclose(freq, freq[0] * np.arange(1, G + 1, dtype=np.float32),
                    rtol=1e-6, atol=0.0))

    params = dict(grid_size=G, input_dim=K, output_dim=N,
                  padded_output_dim=Np, harmonic=harmonic)
    params["bias"] = jnp.asarray(np.pad(bias, ((0, 0), (0, Np - N))), jnp.float32)

    if harmonic:
        # sin(f_g x + p) = sin((g+1)θ)cos(p) + cos((g+1)θ)sin(p);
        # fold cos(p)/sin(p) into a doubled weight matrix (contraction 2*G*K).
        w_sin = (amp_gkn * np.cos(phase_gk)[:, :, None]).reshape(G * K, N)
        w_cos = (amp_gkn * np.sin(phase_gk)[:, :, None]).reshape(G * K, N)
        w = np.concatenate([w_sin, w_cos], axis=0)           # (2*G*K, N)
        params["base_freq"] = float(freq[0])
    else:
        w = amp_gkn.reshape(G * K, N)                        # (G*K, N)
        params["freq_row"] = jnp.asarray(
            np.repeat(freq, K).reshape(1, G * K), jnp.float32)
        params["phase_row"] = jnp.asarray(
            phase_gk.reshape(1, G * K), jnp.float32)
    params["w"] = jnp.asarray(np.pad(w, ((0, 0), (0, Np - N))), w_dtype)
    return params


# ---------------------------------------------------------------------------
# Forward wrapper
# ---------------------------------------------------------------------------
def sinekan_forward(x, params, *, tm=512):
    """x: (..., input_dim) -> (..., output_dim)."""
    K = params["input_dim"]
    N = params["output_dim"]
    Np = params["padded_output_dim"]
    G = params["grid_size"]
    w = params["w"]
    bias = params["bias"]

    x_shape = x.shape
    x2 = x.reshape(-1, K)
    B = x2.shape[0]

    # Row tile: large (amortize per-step overhead, fill MXU rows), multiple of
    # 8, clamped to the batch; keep >= 2 grid steps when possible (v7x has 2
    # TensorCores sharded over the "parallel" axis).
    B8 = _round_up(B, 8)
    tm_eff = int(min(_round_up(tm, 8), B8))
    if B8 > 8 and pl.cdiv(B, tm_eff) < 2:
        tm_eff = _round_up(pl.cdiv(B8, 2), 8)
    grid_m = pl.cdiv(B, tm_eff)      # ragged last tile handled by Pallas masking

    contraction = w.shape[0]
    flops = 2 * B * contraction * Np
    transcendentals = (2 * B * K) if params["harmonic"] else (B * G * K)
    bytes_accessed = (x2.size * x2.dtype.itemsize
                      + w.size * w.dtype.itemsize
                      + B * Np * x2.dtype.itemsize
                      + bias.size * 4)
    cost = pl.CostEstimate(flops=flops, transcendentals=transcendentals,
                           bytes_accessed=bytes_accessed)

    # VMEM budget: double-buffered x/out tiles + resident weights, 2x headroom,
    # kept safely under v7x's 64 MiB physical VMEM.
    need = (2 * tm_eff * (K + Np) * 4 + w.size * w.dtype.itemsize
            + 8 * Np * 4 + 4 * G * K * 4)
    vmem_limit = int(min(48 * 1024 * 1024, max(2 * need, 32 * 1024 * 1024)))

    compiler_params = pltpu.CompilerParams(
        dimension_semantics=("parallel",),
        vmem_limit_bytes=vmem_limit)

    if params["harmonic"]:
        kernel = functools.partial(_sinekan_harmonic_kernel,
                                   grid_size=G, base_freq=params["base_freq"])
        in_specs = [
            pl.BlockSpec((tm_eff, K), lambda i: (i, 0)),       # x tile
            pl.BlockSpec((2 * G * K, Np), lambda i: (0, 0)),   # folded weights
            pl.BlockSpec((1, Np), lambda i: (0, 0)),           # bias
        ]
        operands = (x2, w, bias)
    else:
        kernel = functools.partial(_sinekan_generic_kernel, grid_size=G)
        in_specs = [
            pl.BlockSpec((tm_eff, K), lambda i: (i, 0)),       # x tile
            pl.BlockSpec((1, G * K), lambda i: (0, 0)),        # freq row
            pl.BlockSpec((1, G * K), lambda i: (0, 0)),        # phase row
            pl.BlockSpec((G * K, Np), lambda i: (0, 0)),       # weights
            pl.BlockSpec((1, Np), lambda i: (0, 0)),           # bias
        ]
        operands = (x2, params["freq_row"], params["phase_row"], w, bias)

    out = pl.pallas_call(
        kernel,
        out_shape=jax.ShapeDtypeStruct((B, Np), x2.dtype),
        grid_spec=pltpu.PrefetchScalarGridSpec(
            num_scalar_prefetch=0,
            grid=(grid_m,),
            in_specs=in_specs,
            out_specs=pl.BlockSpec((tm_eff, Np), lambda i: (i, 0)),
        ),
        compiler_params=compiler_params,
        cost_estimate=cost,
    )(*operands)

    if Np != N:
        out = out[:, :N]
    return out.reshape(x_shape[:-1] + (N,))


# ---------------------------------------------------------------------------
# Module-style parameter init (mirrors the PyTorch __init__ shapes) + reference
# ---------------------------------------------------------------------------
def make_sinekan_params(key, input_dim, output_dim, grid_size=8,
                        is_first=True, norm_freq=True):
    """Deterministic synthetic init mirroring SineKANLayer.__init__ shapes."""
    k_amp, k_gp, k_ip = jax.random.split(key, 3)
    grid_norm = (jnp.arange(grid_size, dtype=jnp.float32) + 1.0).reshape(1, 1, grid_size)
    if is_first:
        amplitudes = (jax.random.normal(k_amp, (output_dim, input_dim, 1)) * 0.4
                      / output_dim / grid_norm)                       # (N, K, G)
    else:
        amplitudes = (jax.random.uniform(k_amp, (output_dim, input_dim, 1),
                                         minval=-1.0, maxval=1.0)
                      / output_dim / grid_norm)                       # (N, K, G)
    grid_phase = jnp.linspace(0.0, math.pi, grid_size).reshape(1, 1, 1, grid_size)
    input_phase = jnp.linspace(0.0, math.pi, input_dim).reshape(1, 1, input_dim, 1)
    if norm_freq:
        freq = (jnp.arange(1, grid_size + 1, dtype=jnp.float32)
                / (grid_size + 1) ** (1 - int(is_first)))
    else:
        freq = jnp.arange(1, grid_size + 1, dtype=jnp.float32)
    gpp = jax.random.uniform(k_gp, (1, 1, 1, grid_size)) / grid_size * 0.1
    ipp = jax.random.uniform(k_ip, (1, 1, input_dim, 1)) / input_dim * 0.1
    phase = grid_phase + input_phase + gpp + ipp                      # (1, 1, K, G)
    bias = jnp.ones((1, output_dim), jnp.float32) / output_dim
    return (freq.astype(jnp.float32), phase.astype(jnp.float32),
            amplitudes.astype(jnp.float32), bias)


def sinekan_ref(x, freq, phase, amplitudes, bias):
    """Pure-JAX mirror of the PyTorch forward (correctness reference)."""
    N, K, G = amplitudes.shape
    x_shape = x.shape
    x2 = x.reshape(-1, K)
    s = jnp.sin(x2[:, :, None] * freq.reshape(1, 1, G) + phase.reshape(1, K, G))
    y = jnp.einsum("ikl,jkl->ij", s, amplitudes) + bias
    return y.reshape(x_shape[:-1] + (N,))


if __name__ == "__main__":
    input_dim, output_dim, grid_size = 16, 32, 8
    key = jax.random.PRNGKey(0)
    kp, kx1, kx2 = jax.random.split(key, 3)

    freq, phase, amplitudes, bias = make_sinekan_params(
        kp, input_dim, output_dim, grid_size, is_first=True, norm_freq=True)

    # --- f32 weights, harmonic fast path (auto-detected from freq pattern) ---
    x = jax.random.normal(kx1, (2, 4, input_dim), dtype=jnp.float32)
    y_ref = sinekan_ref(x, freq, phase, amplitudes, bias)

    p_f32 = prepare_kernel_params(freq, phase, amplitudes, bias, use_bf16=False)
    assert p_f32["harmonic"]
    y = jax.block_until_ready(sinekan_forward(x, p_f32))
    assert y.shape == (2, 4, output_dim)
    assert jnp.allclose(y, y_ref, atol=3e-5, rtol=3e-5), "harmonic f32 mismatch"

    # --- f32 weights, generic (arbitrary-frequency) path ---
    p_gen = prepare_kernel_params(freq, phase, amplitudes, bias,
                                  use_bf16=False, force_generic=True)
    y_g = jax.block_until_ready(sinekan_forward(x, p_gen))
    assert jnp.allclose(y_g, y_ref, atol=3e-5, rtol=3e-5), "generic f32 mismatch"

    # --- bf16 weights (default) with a multi-step grid ---
    p_bf16 = prepare_kernel_params(freq, phase, amplitudes, bias)
    x_big = jax.random.normal(kx2, (4, 16, input_dim), dtype=jnp.float32)
    y_big = jax.block_until_ready(sinekan_forward(x_big, p_bf16, tm=16))
    y_big_ref = sinekan_ref(x_big, freq, phase, amplitudes, bias)
    assert y_big.shape == (4, 16, output_dim)
    assert jnp.allclose(y_big, y_big_ref, atol=1e-2, rtol=1e-2), "bf16 mismatch"

    print("KERNEL_OK")
</pallas_src>

<mosaic_0001>
module attributes {stable_mosaic.version = 11 : i64} {
  func.func @_sinekan_harmonic_kernel(%arg0: i32, %arg1: memref<8x16xf32, #tpu.memory_space<vmem>>, %arg2: memref<256x128xf32, #tpu.memory_space<vmem>>, %arg3: memref<1x128xf32, #tpu.memory_space<vmem>>, %arg4: memref<8x128xf32, #tpu.memory_space<vmem>>) attributes {dimension_semantics = [#tpu.dimension_semantics<parallel>], iteration_bounds = array<i64: 1>, scalar_prefetch = 0 : i64, scratch_operands = 0 : i64, tpu.core_type = #tpu.core_type<tc>, window_params = [{transform_indices = @transform_0, window_bounds = array<i64: 8, 16>}, {pipeline_mode = #tpu.pipeline_mode<synchronous>, transform_indices = @transform_1, window_bounds = array<i64: 256, 128>}, {pipeline_mode = #tpu.pipeline_mode<synchronous>, transform_indices = @transform_2, window_bounds = array<i64: 1, 128>}, {transform_indices = @transform_3, window_bounds = array<i64: 8, 128>}]} {
    %c0 = arith.constant 0 : index
    %c0_0 = arith.constant 0 : index
    %0 = vector.load %arg1[%c0, %c0_0] : memref<8x16xf32, #tpu.memory_space<vmem>>, vector<8x16xf32>
    %cst = arith.constant 1.000000e+00 : f32
    %1 = vector.broadcast %cst : f32 to vector<8x16xf32>
    %2 = arith.mulf %0, %1 : vector<8x16xf32>
    %3 = math.sin %2 : vector<8x16xf32>
    %4 = math.cos %2 : vector<8x16xf32>
    %5 = arith.mulf %3, %4 : vector<8x16xf32>
    %6 = arith.mulf %4, %3 : vector<8x16xf32>
    %7 = arith.addf %5, %6 : vector<8x16xf32>
    %8 = arith.mulf %4, %4 : vector<8x16xf32>
    %9 = arith.mulf %3, %3 : vector<8x16xf32>
    %10 = arith.subf %8, %9 : vector<8x16xf32>
    %11 = arith.mulf %7, %4 : vector<8x16xf32>
    %12 = arith.mulf %10, %3 : vector<8x16xf32>
    %13 = arith.addf %11, %12 : vector<8x16xf32>
    %14 = arith.mulf %10, %4 : vector<8x16xf32>
    %15 = arith.mulf %7, %3 : vector<8x16xf32>
    %16 = arith.subf %14, %15 : vector<8x16xf32>
    %17 = arith.mulf %13, %4 : vector<8x16xf32>
    %18 = arith.mulf %16, %3 : vector<8x16xf32>
    %19 = arith.addf %17, %18 : vector<8x16xf32>
    %20 = arith.mulf %16, %4 : vector<8x16xf32>
    %21 = arith.mulf %13, %3 : vector<8x16xf32>
    %22 = arith.subf %20, %21 : vector<8x16xf32>
    %23 = arith.mulf %19, %4 : vector<8x16xf32>
    %24 = arith.mulf %22, %3 : vector<8x16xf32>
    %25 = arith.addf %23, %24 : vector<8x16xf32>
    %26 = arith.mulf %22, %4 : vector<8x16xf32>
    %27 = arith.mulf %19, %3 : vector<8x16xf32>
    %28 = arith.subf %26, %27 : vector<8x16xf32>
    %29 = arith.mulf %25, %4 : vector<8x16xf32>
    %30 = arith.mulf %28, %3 : vector<8x16xf32>
    %31 = arith.addf %29, %30 : vector<8x16xf32>
    %32 = arith.mulf %28, %4 : vector<8x16xf32>
    %33 = arith.mulf %25, %3 : vector<8x16xf32>
    %34 = arith.subf %32, %33 : vector<8x16xf32>
    %35 = arith.mulf %31, %4 : vector<8x16xf32>
    %36 = arith.mulf %34, %3 : vector<8x16xf32>
    %37 = arith.addf %35, %36 : vector<8x16xf32>
    %38 = arith.mulf %34, %4 : vector<8x16xf32>
    %39 = arith.mulf %31, %3 : vector<8x16xf32>
    %40 = arith.subf %38, %39 : vector<8x16xf32>
    %41 = arith.mulf %37, %4 : vector<8x16xf32>
    %42 = arith.mulf %40, %3 : vector<8x16xf32>
    %43 = arith.addf %41, %42 : vector<8x16xf32>
    %44 = arith.mulf %40, %4 : vector<8x16xf32>
    %45 = arith.mulf %37, %3 : vector<8x16xf32>
    %46 = arith.subf %44, %45 : vector<8x16xf32>
    %47 = tpu.concatenate %3, %7, %13, %19, %25, %31, %37, %43, %4, %10, %16, %22, %28, %34, %40, %46 in 1 : vector<8x16xf32>, vector<8x16xf32>, vector<8x16xf32>, vector<8x16xf32>, vector<8x16xf32>, vector<8x16xf32>, vector<8x16xf32>, vector<8x16xf32>, vector<8x16xf32>, vector<8x16xf32>, vector<8x16xf32>, vector<8x16xf32>, vector<8x16xf32>, vector<8x16xf32>, vector<8x16xf32>, vector<8x16xf32> -> vector<8x256xf32>
    %c0_1 = arith.constant 0 : index
    %c0_2 = arith.constant 0 : index
    %48 = vector.load %arg2[%c0_1, %c0_2] : memref<256x128xf32, #tpu.memory_space<vmem>>, vector<256x128xf32>
    %cst_3 = arith.constant dense<0.000000e+00> : vector<8x128xf32>
    %49 = tpu.matmul %47, %48, %cst_3 {dimension_numbers = #tpu.dot_dimension_numbers<[1], [0], [0], [1], [0, 0, 1, 1], [], []>} : vector<8x256xf32>, vector<256x128xf32>, vector<8x128xf32> -> vector<8x128xf32>
    %c0_4 = arith.constant 0 : index
    %c0_5 = arith.constant 0 : index
    %50 = vector.load %arg3[%c0_4, %c0_5] : memref<1x128xf32, #tpu.memory_space<vmem>>, vector<1x128xf32>
    %51 = vector.broadcast %50 : vector<1x128xf32> to vector<8x128xf32>
    %52 = arith.addf %49, %51 : vector<8x128xf32>
    %c0_6 = arith.constant 0 : index
    %c0_7 = arith.constant 0 : index
    %53 = vector.load %arg4[%c0_6, %c0_7] : memref<8x128xf32, #tpu.memory_space<vmem>>, vector<8x128xf32>
    tpu.vector_store %arg4[%c0_6, %c0_7], %52 {strides = array<i32>} : memref<8x128xf32, #tpu.memory_space<vmem>>, vector<8x128xf32>,
    return
  }
  func.func @transform_0(%arg0: i32) -> (i32, i32) {
    %c0_i32 = arith.constant 0 : i32
    %c0_i32_0 = arith.constant 0 : i32
    return %arg0, %c0_i32 : i32, i32
  }
  func.func @transform_1(%arg0: i32) -> (i32, i32) {
    %c0_i32 = arith.constant 0 : i32
    %c0_i32_0 = arith.constant 0 : i32
    %c0_i32_1 = arith.constant 0 : i32
    return %c0_i32, %c0_i32_0 : i32, i32
  }
  func.func @transform_2(%arg0: i32) -> (i32, i32) {
    %c0_i32 = arith.constant 0 : i32
    %c0_i32_0 = arith.constant 0 : i32
    %c0_i32_1 = arith.constant 0 : i32
    return %c0_i32, %c0_i32_0 : i32, i32
  }
  func.func @transform_3(%arg0: i32) -> (i32, i32) {
    %c0_i32 = arith.constant 0 : i32
    %c0_i32_0 = arith.constant 0 : i32
    return %arg0, %c0_i32 : i32, i32
  }
}

</mosaic_0001>

<bundles_post_ra>
// kernel: tpu_custom_call.1
= control target key start
LH: loop header
LB: loop body
LE: loop exit
PB: predicated region body
PF: predicated region fallthrough
CT: control target
= control target key end

     0   :  { %8 = vsyncpa [#allocation3], 0  ;;  %s840_s0 = inlined_call_operand.hbm [shape: f32[8,16], index: 0, kind: input, shape index: {}]   ;;  %s841_s1 = inlined_call_operand.hbm [shape: f32[256,128], index: 1, kind: input, shape index: {}]   ;;  %s842_s2 = inlined_call_operand.vmem [shape: f32[1,128], index: 2, kind: input, shape index: {}]   ;;  %s843_s3 = inlined_call_operand.hbm [shape: f32[8,128], index: 3, kind: output, shape index: {}]  }
   0x1   :  { %9 = vsyncpa [#allocation6], 0 }
   0x2   :  { %10 = vsyncpa [#allocation4], 0  ;;  %s16_s14 = sshll.u32 %s840_s0, 4  ;;  %s707_s15 = smov [#allocation2]   ;;  %s17_s14 = int_to_ptr.hbm [resolvable:$true] %s16_s14 }
   0x3   :  { %s18_s16 = sshll.u32 %s707_s15, 4  ;;  %s26_s19 = sshll.u32 %s841_s1, 4  ;;  %s19_s16 = int_to_ptr.vmem [resolvable:$true] %s18_s16  ;;  %s27_s19 = int_to_ptr.hbm [resolvable:$true] %s26_s19 }
   0x4   :  { %21 = dma.hbm_to_vmem [thread:$0]  %s17_s14, 128, %s19_s16, [#allocation3]  }
   0x5   :  { %s708_s20 = smov [#allocation5]   ;;  %s709_s22 = smov 128  }
   0x6   :  { %s28_s21 = sshll.u32 %s708_s20, 4  ;;  %s710_s23 = smov 8   ;;  %s29_s21 = int_to_ptr.vmem [resolvable:$true] %s28_s21 }
   0x7   :  { %34 = dma.hbm_to_vmem [thread:$0]  %s27_s19, 4096, %s29_s21, [#allocation6], %s709_s22, %s709_s22, %s710_s23  }
   0x8   :  { %701 = dma.done.wait [#allocation3], 128  }
   0x9   :  { %702 = vsyncadd [#allocation3], 4294967168 }
   0xa   :  { %703 = dma.done.wait [#allocation6], 4096  }
   0xb   :  { %704 = vsyncadd [#allocation6], 4294963200  ;;  %v752_v0 = vld [vmem:[#allocation2] sm:$0xff]  ;;  %v711_v12 = vmov 683565275   ;;  %s718_s0 = smov 16  }
   0xc   :  { %v49_v1 = vand.u32 2139095040, %v752_v0  ;;  %v46_v3 = vand.u32 2147483647, %v752_v0  ;;  %v712_v14 = vmov 2475754826   ;;  %vm48_vm12 = vcmp.lt.s32.totalorder %v752_v0, 0 }
   0xd   :  { %v713_v16 = vmov 2131351028   ;;  %v714_v18 = vmov 2102212464   ;;  %v715_v20 = vmov 920167782  }
   0xe   :  { %v50_v2 = vshrl.u32 %v49_v1, 23  ;;  %v53_v6 = vand.u32 8388607, %v46_v3  ;;  %v716_v26 = vmov 1326507024   ;;  %v717_v1 = vmov 0  }
   0xf   :  { %vm47_vm13 = vcmp.le.f32.partialorder %v46_v3, 0.7853982  ;;  %s719_s1 = smov 32   ;;  %s720_s24 = smov 48  }
  0x10   :  { %v568_v4 = vadd.s32 4294967169, %v50_v2  ;;  %v54_v9 = vor.u32 8388608, %v53_v6  ;;  %s721_s25 = smov 64   ;;  %s722_s26 = smov 80  }
  0x11   :  { %s723_s27 = smov 112   ;;  %s724_s28 = smov 96  }
  0x12   :  { %v56_v5 = vadd.s32 1, %v568_v4  ;;  %v761_v28 = vshll.u32 %v54_v9, 8  ;;  %s725_s4 = smov [#allocation7]   ;;  %s557_s8 = sshll.u32 %s843_s3, 4  ;;  %s558_s8 = int_to_ptr.hbm [resolvable:$true] %s557_s8 }
  0x13   :  { %s555_s5 = sshll.u32 %s725_s4, 4  ;;  %s556_s5 = int_to_ptr.vmem [resolvable:$true] %s555_s5 }
  0x14   :  { %vm57_vm0 = vcmp.gt.s32.totalorder %v56_v5, 0  ;;  %v95_v40 = vand.u32 65535, %v761_v28  ;;  %v96_v41 = vshrl.u32 %v761_v28, 16 }
  0x15   :  { %v58_v7 = vsel %vm57_vm0, %v56_v5, 0 }
  0x16   :  { %v60_v8 = vand.u32 31, %v58_v7  ;;  %v758_v10 = vshrl.u32 %v58_v7, 5 }
  0x18   :  { %v61_v11 = vsub.s32 32, %v60_v8  ;;  %v63_v13 = vshll.u32 %v711_v12, %v60_v8  ;;  %v66_v15 = vshll.u32 %v712_v14, %v60_v8  ;;  %v69_v17 = vshll.u32 %v713_v16, %v60_v8 }
  0x19   :  { %v72_v19 = vshll.u32 %v714_v18, %v60_v8  ;;  %v75_v21 = vshll.u32 %v715_v20, %v60_v8  ;;  %vm78_vm1 = vcmp.lt.s32.totalorder %v758_v10, 1  ;;  %vm81_vm2 = vcmp.lt.s32.totalorder %v758_v10, 4 }
  0x1a   :  { %v64_v22 = vshrl.u32 %v712_v14, %v61_v11  ;;  %v67_v23 = vshrl.u32 %v713_v16, %v61_v11  ;;  %v70_v24 = vshrl.u32 %v714_v18, %v61_v11  ;;  %v73_v25 = vshrl.u32 %v715_v20, %v61_v11 }
  0x1b   :  { %v76_v27 = vshrl.u32 %v716_v26, %v61_v11  ;;  %vm80_vm3 = vcmp.lt.s32.totalorder %v758_v10, 3  ;;  %vm79_vm4 = vcmp.lt.s32.totalorder %v758_v10, 2  ;;  %v62_v48 = vshrl.u32 %v711_v12, %v61_v11 }
  0x1c   :  { %v65_v29 = vor.u32 %v64_v22, %v63_v13  ;;  %v68_v30 = vor.u32 %v67_v23, %v66_v15  ;;  %v71_v31 = vor.u32 %v70_v24, %v69_v17  ;;  %v74_v32 = vor.u32 %v73_v25, %v72_v19 }
  0x1d   :  { %v77_v33 = vor.u32 %v76_v27, %v75_v21 }
  0x1e   :  { %v86_v34 = vsel %vm78_vm1, %v65_v29, %v68_v30  ;;  %v90_v35 = vsel %vm78_vm1, %v68_v30, %v71_v31  ;;  %v87_v36 = vsel %vm81_vm2, %v74_v32, 920167782  ;;  %v82_v61 = vsel %vm78_vm1, %v62_v48, %v65_v29 }
  0x1f   :  { %v91_v37 = vsel %vm81_vm2, %v77_v33, 1326507024  ;;  %v88_v38 = vsel %vm80_vm3, %v71_v31, %v87_v36  ;;  %v83_v63 = vsel %vm81_vm2, %v71_v31, 2102212464 }
  0x20   :  { %v92_v39 = vsel %vm80_vm3, %v74_v32, %v91_v37  ;;  %v89_v42 = vsel %vm79_vm4, %v86_v34, %v88_v38  ;;  %v84_v12 = vsel %vm80_vm3, %v68_v30, %v83_v63 }
  0x21   :  { %v93_v43 = vsel %vm79_vm4, %v90_v35, %v92_v39  ;;  %v119_v46 = vand.u32 65535, %v89_v42  ;;  %v120_v47 = vshrl.u32 %v89_v42, 16  ;;  %v85_v20 = vsel %vm79_vm4, %v82_v61, %v84_v12 }
  0x22   :  { %v97_v44 = vand.u32 65535, %v93_v43  ;;  %v98_v45 = vshrl.u32 %v93_v43, 16  ;;  %v139_v24 = vmul.u32 %v761_v28, %v85_v20  ;;  %vm189_vm4 = vweird.f32 %v752_v0 }
  0x23   :  { %v121_v52 = vmul.u32 %v119_v46, %v95_v40  ;;  %v122_v53 = vmul.u32 %v120_v47, %v95_v40  ;;  %v123_v54 = vmul.u32 %v119_v46, %v96_v41  ;;  %v124_v58 = vmul.u32 %v120_v47, %v96_v41 }
  0x24   :  { %v99_v49 = vmul.u32 %v97_v44, %v95_v40  ;;  %v100_v50 = vmul.u32 %v98_v45, %v95_v40  ;;  %v101_v51 = vmul.u32 %v97_v44, %v96_v41  ;;  %v102_v55 = vmul.u32 %v98_v45, %v96_v41 }
  0x25   :  { %v125_v59 = vshll.u32 %v122_v53, 16  ;;  %v127_v60 = vshll.u32 %v123_v54, 16  ;;  %v126_v9 = vshrl.u32 %v122_v53, 16  ;;  %v128_v16 = vshrl.u32 %v123_v54, 16 }
  0x26   :  { %v103_v56 = vshll.u32 %v100_v50, 16  ;;  %v105_v57 = vshll.u32 %v101_v51, 16  ;;  %v104_v5 = vshrl.u32 %v100_v50, 16  ;;  %v106_v13 = vshrl.u32 %v101_v51, 16 }
  0x27   :  { %vm129_vm6 = vc.u32 %v121_v52, %v125_v59  ;;  %v131_v4 = vadd.s32 %v125_v59, %v121_v52 }
  0x28   :  { %vm107_vm5 = vc.u32 %v99_v49, %v103_v56  ;;  %v109_v62 = vadd.s32 %v103_v56, %v99_v49  ;;  %v130_v7 = vsel %vm129_vm6, 1, %v717_v1  ;;  %vm454_vm6 = vcmask 261120  }
  0x29   :  { %v108_v2 = vsel %vm107_vm5, 1, %v717_v1  ;;  %v132_v11 = vadd.s32 %v130_v7, %v124_v58  ;;  %vm133_vm8 = vc.u32 %v131_v4, %v127_v60  ;;  %v135_v19 = vadd.s32 %v131_v4, %v127_v60 }
  0x2a   :  { %v110_v6 = vadd.s32 %v108_v2, %v102_v55  ;;  %vm111_vm7 = vc.u32 %v109_v62, %v105_v57  ;;  %v134_v15 = vsel %vm133_vm8, 1, %v717_v1  ;;  %vm452_vm5 = vcmask 130048  }
  0x2b   :  { %v112_v8 = vsel %vm111_vm7, 1, %v717_v1  ;;  %v136_v17 = vadd.s32 %v134_v15, %v132_v11  ;;  %vm456_vm7 = vcmask 392192   ;;  %vm458_vm8 = vcmask 523264  }
  0x2c   :  { %v114_v14 = vadd.s32 %v112_v8, %v110_v6 }
  0x2d   :  { %v137_v21 = vadd.s32 %v136_v17, %v126_v9 }
  0x2e   :  { %v115_v18 = vadd.s32 %v114_v14, %v104_v5 }
  0x2f   :  { %v138_v23 = vadd.s32 %v137_v21, %v128_v16 }
  0x30   :  { %v116_v22 = vadd.s32 %v115_v18, %v106_v13 }
  0x31   :  { %v142_v25 = vadd.s32 1, %v138_v23 }
  0x32   :  { %vm141_vm9 = vc.u32 %v116_v22, %v135_v19  ;;  %v140_v10 = vadd.s32 %v135_v19, %v116_v22  ;;  %v488_v22 = vld [vmem:[#allocation5 + $0x78] sm:$0xff] }
  0x33   :  { %v143_v26 = vsel %vm141_vm9, %v142_v25, %v138_v23  ;;  %v504_v23 = vld [vmem:[#allocation5 + $0xf8] sm:$0xff]  ;;  %509 = vmatpush.msra.mxu0 %v488_v22  ;;  %vm460_vm9 = vcmask 654336  }
  0x34   :  { %v144_v27 = vadd.s32 %v143_v26, %v139_v24  ;;  %529 = vmatpush.msra.mxu1 %v504_v23  ;;  %v503_v26 = vld [vmem:[#allocation5 + $0xf0] sm:$0xff]  ;;  %v496_v22 = vld [vmem:[#allocation5 + $0xb8] sm:$0xff] }
  0x35   :  { %v479_v23 = vld [vmem:[#allocation5 + $0x30] sm:$0xff] }
  0x36   :  { %v145_v29 = vadd.s32 536870912, %v144_v27  ;;  %530 = vmatpush.msra.mxu1 %v503_v26  ;;  %v477_v26 = vld [vmem:[#allocation5 + $0x20] sm:$0xff] }
  0x38   :  { %v146_v30 = vshrl.u32 %v145_v29, 30 }
  0x3a   :  { %v147_v31 = vshll.u32 %v146_v30, 30  ;;  %v170_v48 = vsub.s32 4, %v146_v30 }
  0x3c   :  { %v148_v32 = vsub.s32 %v144_v27, %v147_v31  ;;  %v171_v51 = vsel %vm48_vm12, %v170_v48, %v146_v30  ;;  %v486_v27 = vld [vmem:[#allocation5 + $0x68] sm:$0xff] }
  0x3d   :  { %v173_v54 = vsel %vm47_vm13, 0, %v171_v51 }
  0x3e   :  { %vm149_vm10 = vcmp.lt.s32.totalorder %v148_v32, 0  ;;  %v150_v33 = vsub.s32 0, %v148_v32  ;;  %v190_v59 = vadd.s32 3, %v173_v54  ;;  %v345_v2 = vand.u32 3, %v173_v54 }
  0x40   :  { %v151_v34 = vsel %vm149_vm10, %v150_v33, %v148_v32  ;;  %v191_v1 = vand.u32 3, %v190_v59  ;;  %vm350_vm15 = vcmp.eq.s32.totalorder %v345_v2, 2  ;;  %vm347_vm2 = vcmp.eq.s32.totalorder %v345_v2, 0  ;;  %v502_v33 = vld [vmem:[#allocation5 + $0xe8] sm:$0xff] }
  0x41   :  { %v152_v35 = vclz %v151_v34  ;;  %vm346_vm3 = vcmp.lt.s32.totalorder %v345_v2, 2  ;;  %531 = vmatpush.msra.mxu1 %v502_v33  ;;  %v474_v33 = vld [vmem:[#allocation5 + $0x8] sm:$0xff]  ;;  %vm462_vm10 = vcmask 785408  }
  0x42   :  { %vm196_vm14 = vcmp.eq.s32.totalorder %v191_v1, 2  ;;  %vm192_vm0 = vcmp.lt.s32.totalorder %v191_v1, 2  ;;  %vm193_vm1 = vcmp.eq.s32.totalorder %v191_v1, 0 }
  0x43   :  { %v569_v36 = vadd.s32 4294967294, %v152_v35 }
  0x45   :  { %vm570_vm11 = vcmp.lt.s32.totalorder %v569_v36, 0 }
  0x46   :  { %v155_v37 = vsel %vm570_vm11, 0, %v569_v36  ;;  %vm464_vm11 = vcmask 916480  }
  0x47   :  { %v156_v38 = vsub.s32 32, %v155_v37  ;;  %v157_v39 = vshll.u32 %v148_v32, %v155_v37  ;;  %v160_v40 = vsub.s32 4294967266, %v155_v37 }
  0x49   :  { %v158_v28 = vshrl.u32 %v140_v10, %v156_v38  ;;  %v161_v41 = vadd.s32 127, %v160_v40 }
  0x4b   :  { %v159_v42 = vor.u32 %v158_v28, %v157_v39  ;;  %v162_v43 = vshll.u32 %v161_v41, 23 }
  0x4d   :  { %v163_v44 = vor.u32 4788187, %v162_v43  ;;  %v166_v45 = vcvt.s32.f32 %v159_v42 }
  0x4f   :  { %v164_v46 = vand.u32 2147483647, %v163_v44 }
  0x51   :  { %v167_v47 = vmul.f32 %v166_v45, %v164_v46 }
  0x53   :  { %v168_v49 = vxor.u32 2147483648, %v167_v47 }
  0x55   :  { %v169_v50 = vsel %vm48_vm12, %v168_v49, %v167_v47 }
  0x56   :  { %v172_v52 = vsel %vm47_vm13, %v752_v0, %v169_v50  ;;  %v487_v0 = vld [vmem:[#allocation5 + $0x70] sm:$0xff] }
  0x57   :  { %v174_v53 = vmul.f32 %v172_v52, %v172_v52  ;;  %510 = vmatpush.msra.mxu0 %v487_v0  ;;  %v495_v0 = vld [vmem:[#allocation5 + $0xb0] sm:$0xff] }
  0x59   :  { %v175_v55 = vmul.f32 -0.001358992, %v174_v53  ;;  %v182_v56 = vmul.f32 -0.00019511016, %v174_v53  ;;  %511 = vmatpush.msra.mxu0 %v486_v27  ;;  %v493_v27 = vld [vmem:[#allocation5 + $0xa0] sm:$0xff] }
  0x5b   :  { %v176_v57 = vadd.f32 0.041655596, %v175_v55  ;;  %v183_v58 = vadd.f32 0.008332121, %v182_v56 }
  0x5d   :  { %v177_v60 = vmul.f32 %v176_v57, %v174_v53  ;;  %v184_v61 = vmul.f32 %v183_v58, %v174_v53 }
  0x5f   :  { %v178_v62 = vadd.f32 -0.4999988, %v177_v60  ;;  %v185_v63 = vadd.f32 -0.16666654, %v184_v61 }
  0x61   :  { %v179_v4 = vmul.f32 %v178_v62, %v174_v53  ;;  %v186_v3 = vmul.f32 %v185_v63, %v174_v53 }
  0x63   :  { %v180_v5 = vadd.f32 1.0, %v179_v4  ;;  %v187_v6 = vadd.f32 1.0, %v186_v3 }
  0x65   :  { %v188_v7 = vmul.f32 %v187_v6, %v172_v52  ;;  %v197_v8 = vxor.u32 2147483648, %v180_v5 }
  0x67   :  { %v194_v9 = vxor.u32 2147483648, %v188_v7  ;;  %v198_v11 = vsel %vm196_vm14, %v197_v8, %v188_v7  ;;  %v352_v12 = vsel %vm350_vm15, %v197_v8, %v188_v7  ;;  %v485_v8 = vld [vmem:[#allocation5 + $0x60] sm:$0xff] }
  0x68   :  { %512 = vmatpush.msra.mxu0 %v485_v8 }
  0x69   :  { %v195_v13 = vsel %vm193_vm1, %v180_v5, %v194_v9  ;;  %v349_v14 = vsel %vm347_vm2, %v180_v5, %v194_v9  ;;  %v501_v9 = vld [vmem:[#allocation5 + $0xe0] sm:$0xff] }
  0x6a   :  { %v199_v15 = vsel %vm192_vm0, %v195_v13, %v198_v11  ;;  %v353_v16 = vsel %vm346_vm3, %v349_v14, %v352_v12  ;;  %v484_v11 = vld [vmem:[#allocation5 + $0x58] sm:$0xff]  ;;  %532 = vmatpush.msra.mxu1 %v501_v9  ;;  %v483_v13 = vld [vmem:[#allocation5 + $0x50] sm:$0xff] }
  0x6b   :  { %v798_v17 = vsel %vm189_vm4, nan, %v199_v15  ;;  %v800_v18 = vsel %vm189_vm4, nan, %v353_v16  ;;  %v500_v12 = vld [vmem:[#allocation5 + $0xd8] sm:$0xff]  ;;  %v499_v14 = vld [vmem:[#allocation5 + $0xd0] sm:$0xff]  ;;  %513 = vmatpush.msra.mxu0 %v484_v11  ;;  %v482_v15 = vld [vmem:[#allocation5 + $0x48] sm:$0xff] }
  0x6c   :  { %v355_v19 = vmul.f32 %v800_v18, %v798_v17  ;;  %v357_v20 = vmul.f32 %v800_v18, %v800_v18  ;;  %v358_v21 = vmul.f32 %v798_v17, %v798_v17  ;;  %533 = vmatpush.msra.mxu1 %v500_v12  ;;  %v498_v16 = vld [vmem:[#allocation5 + $0xc8] sm:$0xff] }
  0x6d   :  { %514 = vmatpush.msra.mxu0 %v483_v13 }
  0x6e   :  { %v356_v24 = vadd.f32 %v355_v19, %v355_v19  ;;  %v359_v25 = vsub.f32 %v357_v20, %v358_v21  ;;  %534 = vmatpush.msra.mxu1 %v499_v14  ;;  %v481_v19 = vld [vmem:[#allocation5 + $0x40] sm:$0xff]  ;;  %v480_v21 = vld [vmem:[#allocation5 + $0x38] sm:$0xff] }
  0x6f   :  { %515 = vmatpush.msra.mxu0 %v482_v15  ;;  %v497_v20 = vld [vmem:[#allocation5 + $0xc0] sm:$0xff] }
  0x70   :  { %v361_v29 = vmul.f32 %v359_v25, %v798_v17  ;;  %v363_v30 = vmul.f32 %v359_v25, %v800_v18  ;;  %v593_v31 = vpack.i.bf16 %v359_v25, %v356_v24  ;;  %v360_v32 = vmul.f32 %v356_v24, %v800_v18  ;;  %535 = vmatpush.msra.mxu1 %v498_v16  ;;  %v494_v25 = vld [vmem:[#allocation5 + $0xa8] sm:$0xff] }
  0x71   :  { %v364_v34 = vmul.f32 %v356_v24, %v798_v17  ;;  %516 = vmatpush.msra.mxu0 %v481_v19  ;;  %v478_v24 = vld [vmem:[#allocation5 + $0x28] sm:$0xff] }
  0x72   :  { %594 = vrot.lane.b32.xlu0 %v593_v31, %s718_s0  ;;  %v362_v35 = vadd.f32 %v361_v29, %v360_v32  ;;  %536 = vmatpush.msra.mxu1 %v497_v20  ;;  %v476_v29 = vld [vmem:[#allocation5 + $0x18] sm:$0xff]  ;;  %v475_v31 = vld [vmem:[#allocation5 + $0x10] sm:$0xff] }
  0x73   :  { %v365_v36 = vsub.f32 %v363_v30, %v364_v34  ;;  %517 = vmatpush.msra.mxu0 %v480_v21  ;;  %v492_v30 = vld [vmem:[#allocation5 + $0x98] sm:$0xff]  ;;  %v491_v32 = vld [vmem:[#allocation5 + $0x90] sm:$0xff]  ;;  %v490_v34 = vld [vmem:[#allocation5 + $0x88] sm:$0xff] }
  0x74   :  { %v366_v10 = vmul.f32 %v362_v35, %v800_v18  ;;  %v370_v37 = vmul.f32 %v362_v35, %v798_v17  ;;  %537 = vmatpush.msra.mxu1 %v496_v22 }
  0x75   :  { %v367_v38 = vmul.f32 %v365_v36, %v798_v17  ;;  %v369_v39 = vmul.f32 %v365_v36, %v800_v18  ;;  %v598_v40 = vpack.i.bf16 %v365_v36, %v362_v35  ;;  %518 = vmatpush.msra.mxu0 %v479_v23  ;;  %v473_v35 = vld [vmem:[#allocation5] sm:$0xff] }
  0x76   :  { %538 = vmatpush.msra.mxu1 %v495_v0  ;;  %v489_v36 = vld [vmem:[#allocation5 + $0x80] sm:$0xff] }
  0x77   :  { %v368_v28 = vadd.f32 %v367_v38, %v366_v10  ;;  %v371_v41 = vsub.f32 %v369_v39, %v370_v37  ;;  %519 = vmatpush.msra.mxu0 %v478_v24 }
  0x78   :  { %539 = vmatpush.msra.mxu1 %v494_v25 }
  0x79   :  { %v603_v42 = vpack.i.bf16 %v371_v41, %v368_v28  ;;  %v372_v43 = vmul.f32 %v368_v28, %v800_v18  ;;  %v373_v44 = vmul.f32 %v371_v41, %v798_v17  ;;  %v375_v45 = vmul.f32 %v371_v41, %v800_v18  ;;  %520 = vmatpush.msra.mxu0 %v477_v26 }
  0x7a   :  { %599 = vrot.lane.b32.xlu0 %v598_v40, %s719_s1  ;;  %v376_v46 = vmul.f32 %v368_v28, %v798_v17  ;;  %540 = vmatpush.msra.mxu1 %v493_v27 }
  0x7b   :  { %604 = vrot.lane.b32.xlu1 %v603_v42, %s720_s24  ;;  %v374_v47 = vadd.f32 %v373_v44, %v372_v43  ;;  %521 = vmatpush.msra.mxu0 %v476_v29 }
  0x7c   :  { %v377_v48 = vsub.f32 %v375_v45, %v376_v46  ;;  %541 = vmatpush.msra.mxu1 %v492_v30 }
  0x7d   :  { %v378_v49 = vmul.f32 %v374_v47, %v800_v18  ;;  %v382_v50 = vmul.f32 %v374_v47, %v798_v17  ;;  %522 = vmatpush.msra.mxu0 %v475_v31 }
  0x7e   :  { %v379_v51 = vmul.f32 %v377_v48, %v798_v17  ;;  %v381_v52 = vmul.f32 %v377_v48, %v800_v18  ;;  %v608_v53 = vpack.i.bf16 %v377_v48, %v374_v47  ;;  %542 = vmatpush.msra.mxu1 %v491_v32 }
  0x7f   :  { %523 = vmatpush.msra.mxu0 %v474_v33 }
  0x80   :  { %v380_v54 = vadd.f32 %v379_v51, %v378_v49  ;;  %v383_v55 = vsub.f32 %v381_v52, %v382_v50  ;;  %543 = vmatpush.msra.mxu1 %v490_v34 }
  0x81   :  { %524 = vmatpush.msra.mxu0 %v473_v35 }
  0x82   :  { %v384_v56 = vmul.f32 %v380_v54, %v800_v18  ;;  %v385_v57 = vmul.f32 %v383_v55, %v798_v17  ;;  %v387_v58 = vmul.f32 %v383_v55, %v800_v18  ;;  %v388_v59 = vmul.f32 %v380_v54, %v798_v17  ;;  %544 = vmatpush.msra.mxu1 %v489_v36 }
  0x83   :  { %609 = vrot.lane.b32.xlu1 %v608_v53, %s721_s25  ;;  %v613_v60 = vpack.i.bf16 %v383_v55, %v380_v54 }
  0x84   :  { %v386_v61 = vadd.f32 %v385_v57, %v384_v56  ;;  %v389_v62 = vsub.f32 %v387_v58, %v388_v59 }
  0x85   :  { %614 = vrot.lane.b32.xlu2 %v613_v60, %s722_s26 }
  0x86   :  { %v390_v63 = vmul.f32 %v386_v61, %v800_v18  ;;  %v391_v1 = vmul.f32 %v389_v62, %v798_v17  ;;  %v393_v2 = vmul.f32 %v389_v62, %v800_v18  ;;  %v394_v4 = vmul.f32 %v386_v61, %v798_v17 }
  0x87   :  { %v618_v6 = vpack.i.bf16 %v389_v62, %v386_v61 }
  0x88   :  { %v392_v3 = vadd.f32 %v391_v1, %v390_v63  ;;  %v395_v5 = vsub.f32 %v393_v2, %v394_v4 }
  0x8a   :  { %v623_v7 = vpack.i.bf16 %v395_v5, %v392_v3  ;;  %v628_v5 = vld [vmem:[%s842_s2] ss:$0 sm:$0xff] }
  0x8c   :  { %624 = vrot.lane.b32.xlu0 %v623_v7, %s723_s27 }
  0x8d   :  { %619 = vrot.lane.b32.xlu2 %v618_v6, %s724_s28 }
  0xdf   :  { %v615_v28 = vpop.permute.xlu2 %614 }
  0xe0   :  { %v617_v57 = vunpack.i.h.bf16 %v615_v28 }
  0xe4   :  { %v595_v10 = vpop.permute.xlu0 %594 }
  0xe5   :  { %v597_v38 = vunpack.i.h.bf16 %v595_v10  ;;  %v596_v39 = vunpack.i.l.bf16 %v595_v10 }
  0xe7   :  { %v466_v43 = vsel %vm452_vm5, %v800_v18, %v597_v38  ;;  %v453_v44 = vsel %vm452_vm5, %v798_v17, %v596_v39  ;;  %v620_v54 = vpop.permute.xlu2 %619  ;;  %v616_v18 = vunpack.i.l.bf16 %v615_v28 }
  0xe8   :  { %v622_v58 = vunpack.i.h.bf16 %v620_v54  ;;  %v621_v17 = vunpack.i.l.bf16 %v620_v54 }
  0xec   :  { %v600_v40 = vpop.permute.xlu0 %599 }
  0xed   :  { %v605_v37 = vpop.permute.xlu1 %604  ;;  %v602_v41 = vunpack.i.h.bf16 %v600_v40  ;;  %v601_v42 = vunpack.i.l.bf16 %v600_v40 }
  0xee   :  { %v607_v45 = vunpack.i.h.bf16 %v605_v37  ;;  %v606_v46 = vunpack.i.l.bf16 %v605_v37 }
  0xef   :  { %v467_v48 = vsel %vm454_vm6, %v466_v43, %v602_v41  ;;  %v455_v49 = vsel %vm454_vm6, %v453_v44, %v601_v42 }
  0xf0   :  { %v457_v52 = vsel %vm456_vm7, %v455_v49, %v606_v46  ;;  %v468_v53 = vsel %vm456_vm7, %v467_v48, %v607_v45 }
  0xf5   :  { %v610_v47 = vpop.permute.xlu1 %609 }
  0xf6   :  { %v612_v50 = vunpack.i.h.bf16 %v610_v47  ;;  %v611_v51 = vunpack.i.l.bf16 %v610_v47 }
  0xf8   :  { %v469_v55 = vsel %vm458_vm8, %v468_v53, %v612_v50  ;;  %v459_v56 = vsel %vm458_vm8, %v457_v52, %v611_v51 }
  0xf9   :  { %v461_v59 = vsel %vm460_vm9, %v459_v56, %v616_v18  ;;  %v470_v60 = vsel %vm460_vm9, %v469_v55, %v617_v57 }
  0xfa   :  { %v463_v1 = vsel %vm462_vm10, %v461_v59, %v621_v17  ;;  %v471_v2 = vsel %vm462_vm10, %v470_v60, %v622_v58 }
  0xfe   :  { %v625_v61 = vpop.permute.xlu0 %624 }
  0xff   :  { %v627_v62 = vunpack.i.h.bf16 %v625_v61  ;;  %v626_v63 = vunpack.i.l.bf16 %v625_v61 }
 0x101   :  { %v465_v4 = vsel %vm464_vm11, %v463_v1, %v626_v63  ;;  %v472_v3 = vsel %vm464_vm11, %v471_v2, %v627_v62 }
 0x102   :  { %525 = vmatmul.f32.vlgmr.msra.gmra.mxu0 %v465_v4  ;;  %545 = vmatmul.f32.vlgmr.msra.gmra.mxu1 %v472_v3 }
 0x17f   :  { %v526_v6 = vpop.f32.mrf.mxu0  ;;  %v546_v8 = vpop.f32.mrf.mxu1 }
 0x180   :  { %v527_v7 = vadd.f32 %v628_v5, %v526_v6 }
 0x182   :  { %v547_v9 = vadd.f32 %v546_v8, %v527_v7 }
 0x184   :  { %549 = vst [vmem:[#allocation7] sm:$0xff] %v547_v9 }
 0x185   :  { %560 = dma.vmem_to_hbm [thread:$0]  %s556_s5, 128, %s558_s8, [#allocation4]  }
 0x186   :  { %705 = dma.done.wait [#allocation4], 128  }
 0x187   :  { %706 = vsyncadd [#allocation4], 4294967168 }
 0x188   :  { %565 = vsyncpa [#allocation3], 1 }
 0x189   :  { %566 = vsyncpa [#allocation6], 1 }
 0x18a   :  { %567 = vsyncpa [#allocation4], 1 }

</bundles_post_ra>
